<compile_context>
chip_gen: v7x
topology: tpu7x:2x2x1
jax: 0.10.0
libtpu: 0.0.40
codegen_flags: <defaults>
</compile_context>

<pallas_src>
import functools

import jax
import jax.numpy as jnp
from jax.experimental import pallas as pl
from jax.experimental.pallas import tpu as pltpu


# 48 MiB scoped VMEM: safely below v7x's 64 MiB physical, comfortably above the
# per-layer weight set (12*H^2 bf16, double-buffered) + activation tiles for
# the module's H=256.  Re-derive / raise toward ~100 MiB on v5e/v6e if tiles
# are enlarged.
_COMPILER_PARAMS = pltpu.CompilerParams(
    dimension_semantics=("parallel",),
    vmem_limit_bytes=48 * 1024 * 1024,
)


# ----------------------------- kernel helpers -------------------------------


def _layernorm(x, g, b, eps=1e-5):
    mu = jnp.mean(x, axis=-1, keepdims=True)
    var = jnp.mean((x - mu) ** 2, axis=-1, keepdims=True)
    return (x - mu) * jax.lax.rsqrt(var + eps) * g + b


def _encoder_layer_math(x_ref, wqkv_ref, wo_ref, w1_ref, w2_ref,
                        bqkv_ref, vecs_ref, b1_ref, num_heads):
    """Full encoder layer (attention + LN1 + FFN + LN2) for one batch row.

    Returns the (S, H) float32 layer output.
    """
    _, S, H = x_ref.shape
    HD = H // num_heads
    scale = 1.0 / float(HD) ** 0.5

    xb = x_ref[0]                                    # (S, H) bf16
    x = xb.astype(jnp.float32)

    # Fused QKV projection: single (S,H) x (H,3H) matmul, f32 accumulation.
    qkv = jnp.dot(xb, wqkv_ref[...],
                  preferred_element_type=jnp.float32) + bqkv_ref[...]
    q = qkv[:, 0 * H:1 * H].reshape(S, num_heads, HD).astype(jnp.bfloat16)
    k = qkv[:, 1 * H:2 * H].reshape(S, num_heads, HD).astype(jnp.bfloat16)
    v = qkv[:, 2 * H:3 * H].reshape(S, num_heads, HD).astype(jnp.bfloat16)

    # Heads batched in a single einsum pair (no per-head Python loop).
    s = jnp.einsum('qnd,knd->nqk', q, k,
                   preferred_element_type=jnp.float32) * scale      # (nH, S, S)
    s = s - jnp.max(s, axis=-1, keepdims=True)
    p = jnp.exp(s)
    p = p / jnp.sum(p, axis=-1, keepdims=True)                      # exact softmax

    # Emit context directly in (q, head, head_dim) order -> head concat is a
    # contiguous trailing-dim reshape.
    ctx = jnp.einsum('nqk,knd->qnd', p.astype(jnp.bfloat16), v,
                     preferred_element_type=jnp.float32)            # (S, nH, HD)
    ctx = ctx.reshape(S, H)

    # Packed small vectors: rows [bo, ln1_g, ln1_b, b2, ln2_g, ln2_b, 0, 0].
    vecs = vecs_ref[...]                             # (8, H) f32
    bo, ln1g, ln1b = vecs[0:1], vecs[1:2], vecs[2:3]
    b2, ln2g, ln2b = vecs[3:4], vecs[4:5], vecs[5:6]

    # Output projection + residual + LayerNorm1 (dropout identity in eval).
    attn = jnp.dot(ctx.astype(jnp.bfloat16), wo_ref[...],
                   preferred_element_type=jnp.float32) + bo
    y1 = _layernorm(x + attn, ln1g, ln1b)

    # Feed-forward: linear -> ReLU -> linear + residual + LayerNorm2.
    h = jnp.dot(y1.astype(jnp.bfloat16), w1_ref[...],
                preferred_element_type=jnp.float32) + b1_ref[...]
    h = jnp.maximum(h, 0.0)
    ff = jnp.dot(h.astype(jnp.bfloat16), w2_ref[...],
                 preferred_element_type=jnp.float32) + b2
    return _layernorm(y1 + ff, ln2g, ln2b)


# ------------------------------- kernels ------------------------------------


def encoder_layer_kernel(x_ref, wqkv_ref, wo_ref, w1_ref, w2_ref,
                         bqkv_ref, vecs_ref, b1_ref, out_ref, *, num_heads):
    y2 = _encoder_layer_math(x_ref, wqkv_ref, wo_ref, w1_ref, w2_ref,
                             bqkv_ref, vecs_ref, b1_ref, num_heads)
    out_ref[0] = y2.astype(out_ref.dtype)            # bf16 inter-layer handoff


def encoder_last_layer_kernel(x_ref, wqkv_ref, wo_ref, w1_ref, w2_ref,
                              bqkv_ref, vecs_ref, b1_ref,
                              wcls_ref, bcls_ref, logits_ref, *, num_heads):
    """Last layer + mean pool + fused (128-wide) classifier; hidden never stored."""
    y2 = _encoder_layer_math(x_ref, wqkv_ref, wo_ref, w1_ref, w2_ref,
                             bqkv_ref, vecs_ref, b1_ref, num_heads)
    pooled = jnp.mean(y2, axis=0, keepdims=True)     # (1, H) f32 pool over seq
    logits_ref[0] = jnp.dot(pooled, wcls_ref[...],
                            preferred_element_type=jnp.float32) + bcls_ref[...]


# ------------------------------ JAX wrappers ---------------------------------


def _layer_in_specs(S, H, F):
    act = pl.BlockSpec((1, S, H), lambda b: (b, 0, 0))
    const2 = lambda shape: pl.BlockSpec(shape, lambda b: (0, 0))  # resident
    return [act,
            const2((H, 3 * H)),   # wqkv
            const2((H, H)),       # wo
            const2((H, F)),       # w1
            const2((F, H)),       # w2
            const2((1, 3 * H)),   # bqkv
            const2((8, H)),       # packed [bo, ln1g, ln1b, b2, ln2g, ln2b, 0, 0]
            const2((1, F))]       # b1


def run_encoder_layer(x, lp, num_heads):
    B, S, H = x.shape
    F = lp['w1'].shape[1]
    return pl.pallas_call(
        functools.partial(encoder_layer_kernel, num_heads=num_heads),
        out_shape=jax.ShapeDtypeStruct((B, S, H), jnp.bfloat16),
        grid=(B,),
        in_specs=_layer_in_specs(S, H, F),
        out_specs=pl.BlockSpec((1, S, H), lambda b: (b, 0, 0)),
        compiler_params=_COMPILER_PARAMS,
    )(x, lp['wqkv'], lp['wo'], lp['w1'], lp['w2'],
      lp['bqkv'], lp['vecs'], lp['b1'])


def run_last_layer(x, lp, cls, num_heads):
    B, S, H = x.shape
    F = lp['w1'].shape[1]
    P = cls['wcls'].shape[1]
    in_specs = _layer_in_specs(S, H, F) + [
        pl.BlockSpec((H, P), lambda b: (0, 0)),
        pl.BlockSpec((1, P), lambda b: (0, 0)),
    ]
    logits = pl.pallas_call(
        functools.partial(encoder_last_layer_kernel, num_heads=num_heads),
        out_shape=jax.ShapeDtypeStruct((B, 1, P), jnp.float32),
        grid=(B,),
        in_specs=in_specs,
        out_specs=pl.BlockSpec((1, 1, P), lambda b: (b, 0, 0)),
        compiler_params=_COMPILER_PARAMS,
    )(x, lp['wqkv'], lp['wo'], lp['w1'], lp['w2'],
      lp['bqkv'], lp['vecs'], lp['b1'], cls['wcls'], cls['bcls'])
    logits = logits.reshape(B, P)
    return logits[:, :10], logits[:, 10:18], logits[:, 18:24]


def baseline_transformer_forward(params, input_ids):
    """Equivalent of BaselineTransformer.forward(input_ids, attention_mask=None)."""
    _, S = input_ids.shape
    # Embedding lookups (gather) are glue and stay in plain JAX.
    tok = params['token_emb'][input_ids]                       # (B, S, H)
    pos = params['pos_emb'][jnp.arange(S)][None, :, :]         # (1, S, H)
    h = (tok + pos).astype(jnp.bfloat16)                       # bf16 handoff
    layers = params['layers']
    for lp in layers[:-1]:
        h = run_encoder_layer(h, lp, params['num_heads'])
    return run_last_layer(h, layers[-1], params['cls'], params['num_heads'])


# ---------------------------- parameter setup --------------------------------


def init_params(key, vocab_size, hidden_size, num_layers, num_heads, max_pos=512):
    def nrm(k, shape, dtype=jnp.float32, scale=0.02):
        return (scale * jax.random.normal(k, shape)).astype(dtype)

    H = hidden_size
    F = 4 * H
    keys = jax.random.split(key, 3 + num_layers)
    params = {
        'num_heads': num_heads,
        'token_emb': nrm(keys[0], (vocab_size, H)),
        'pos_emb': nrm(keys[1], (max_pos, H)),
        'layers': [],
    }
    for li in range(num_layers):
        lk = jax.random.split(keys[2 + li], 4)
        # Packed vector slab rows: [bo, ln1_g, ln1_b, b2, ln2_g, ln2_b, pad, pad]
        vecs = jnp.zeros((8, H), jnp.float32).at[1].set(1.0).at[4].set(1.0)
        params['layers'].append({
            # Matmul weights stored bf16 (inference-time quantization of the
            # parameters; halves HBM traffic / VMEM residency).  Bias / LN /
            # classifier params stay f32.
            'wqkv': nrm(lk[0], (H, 3 * H), jnp.bfloat16),
            'wo': nrm(lk[1], (H, H), jnp.bfloat16),
            'w1': nrm(lk[2], (H, F), jnp.bfloat16),
            'w2': nrm(lk[3], (F, H), jnp.bfloat16),
            'bqkv': jnp.zeros((1, 3 * H), jnp.float32),
            'vecs': vecs,
            'b1': jnp.zeros((1, F), jnp.float32),
        })
    # Classifier heads fused into a single lane-dense matmul: concat 10+8+6=24
    # columns, zero-pad to 128 lanes; logits are sliced in the wrapper.
    ck = jax.random.split(keys[2 + num_layers], 3)
    wcat = jnp.concatenate(
        [nrm(ck[0], (H, 10)), nrm(ck[1], (H, 8)), nrm(ck[2], (H, 6))], axis=1)
    P = 128
    params['cls'] = {
        'wcls': jnp.zeros((H, P), jnp.float32).at[:, :24].set(wcat),
        'bcls': jnp.zeros((1, P), jnp.float32),
    }
    return params


# --------------------------------- main ---------------------------------------

if __name__ == "__main__":
    VOCAB, HIDDEN, LAYERS, HEADS = 100, 32, 2, 4
    B, S = 2, 8

    key = jax.random.PRNGKey(0)
    pkey, ikey = jax.random.split(key)
    params = init_params(pkey, VOCAB, HIDDEN, LAYERS, HEADS)

    input_ids = jax.random.randint(ikey, (B, S), 0, VOCAB, dtype=jnp.int32)

    syn, sem, prag = baseline_transformer_forward(params, input_ids)
    jax.block_until_ready((syn, sem, prag))

    assert syn.shape == (B, 10) and sem.shape == (B, 8) and prag.shape == (B, 6)
    print("KERNEL_OK")
</pallas_src>

<mosaic_0001>
module attributes {stable_mosaic.version = 11 : i64} {
  func.func @encoder_layer_kernel(%arg0: i32, %arg1: memref<1x8x32xbf16, #tpu.memory_space<vmem>>, %arg2: memref<32x96xbf16, #tpu.memory_space<vmem>>, %arg3: memref<32x32xbf16, #tpu.memory_space<vmem>>, %arg4: memref<32x128xbf16, #tpu.memory_space<vmem>>, %arg5: memref<128x32xbf16, #tpu.memory_space<vmem>>, %arg6: memref<1x96xf32, #tpu.memory_space<vmem>>, %arg7: memref<8x32xf32, #tpu.memory_space<vmem>>, %arg8: memref<1x128xf32, #tpu.memory_space<vmem>>, %arg9: memref<1x8x32xbf16, #tpu.memory_space<vmem>>) attributes {dimension_semantics = [#tpu.dimension_semantics<parallel>], iteration_bounds = array<i64: 2>, scalar_prefetch = 0 : i64, scratch_operands = 0 : i64, tpu.core_type = #tpu.core_type<tc>, window_params = [{transform_indices = @transform_0, window_bounds = array<i64: 1, 8, 32>}, {pipeline_mode = #tpu.pipeline_mode<synchronous>, transform_indices = @transform_1, window_bounds = array<i64: 32, 96>}, {pipeline_mode = #tpu.pipeline_mode<synchronous>, transform_indices = @transform_2, window_bounds = array<i64: 32, 32>}, {pipeline_mode = #tpu.pipeline_mode<synchronous>, transform_indices = @transform_3, window_bounds = array<i64: 32, 128>}, {pipeline_mode = #tpu.pipeline_mode<synchronous>, transform_indices = @transform_4, window_bounds = array<i64: 128, 32>}, {pipeline_mode = #tpu.pipeline_mode<synchronous>, transform_indices = @transform_5, window_bounds = array<i64: 1, 96>}, {pipeline_mode = #tpu.pipeline_mode<synchronous>, transform_indices = @transform_6, window_bounds = array<i64: 8, 32>}, {pipeline_mode = #tpu.pipeline_mode<synchronous>, transform_indices = @transform_7, window_bounds = array<i64: 1, 128>}, {transform_indices = @transform_8, window_bounds = array<i64: 1, 8, 32>}]} {
    %c0 = arith.constant 0 : index
    %c0_0 = arith.constant 0 : index
    %c0_1 = arith.constant 0 : index
    %0 = vector.load %arg1[%c0, %c0_0, %c0_1] : memref<1x8x32xbf16, #tpu.memory_space<vmem>>, vector<1x8x32xbf16>
    %1 = vector.shape_cast %0 : vector<1x8x32xbf16> to vector<8x32xbf16>
    %2 = arith.extf %1 : vector<8x32xbf16> to vector<8x32xf32>
    %c0_2 = arith.constant 0 : index
    %c0_3 = arith.constant 0 : index
    %3 = vector.load %arg2[%c0_2, %c0_3] : memref<32x96xbf16, #tpu.memory_space<vmem>>, vector<32x96xbf16>
    %cst = arith.constant dense<0.000000e+00> : vector<8x96xf32>
    %4 = tpu.matmul %1, %3, %cst {dimension_numbers = #tpu.dot_dimension_numbers<[1], [0], [0], [1], [0, 0, 1, 1], [], []>} : vector<8x32xbf16>, vector<32x96xbf16>, vector<8x96xf32> -> vector<8x96xf32>
    %c0_4 = arith.constant 0 : index
    %c0_5 = arith.constant 0 : index
    %5 = vector.load %arg6[%c0_4, %c0_5] : memref<1x96xf32, #tpu.memory_space<vmem>>, vector<1x96xf32>
    %6 = vector.broadcast %5 : vector<1x96xf32> to vector<8x96xf32>
    %7 = arith.addf %4, %6 : vector<8x96xf32>
    %8 = vector.extract_strided_slice %7 {offsets = [0, 0], sizes = [8, 32], strides = [1, 1]} : vector<8x96xf32> to vector<8x32xf32>
    %9 = vector.shape_cast %8 : vector<8x32xf32> to vector<8x4x8xf32>
    %10 = arith.truncf %9 : vector<8x4x8xf32> to vector<8x4x8xbf16>
    %11 = vector.extract_strided_slice %7 {offsets = [0, 32], sizes = [8, 32], strides = [1, 1]} : vector<8x96xf32> to vector<8x32xf32>
    %12 = vector.shape_cast %11 : vector<8x32xf32> to vector<8x4x8xf32>
    %13 = arith.truncf %12 : vector<8x4x8xf32> to vector<8x4x8xbf16>
    %14 = vector.extract_strided_slice %7 {offsets = [0, 64], sizes = [8, 32], strides = [1, 1]} : vector<8x96xf32> to vector<8x32xf32>
    %15 = vector.shape_cast %14 : vector<8x32xf32> to vector<8x4x8xf32>
    %16 = arith.truncf %15 : vector<8x4x8xf32> to vector<8x4x8xbf16>
    "tpu.trace_start"() <{level = 10 : i32, message = "qnd,knd->nqk"}> : () -> ()
    %cst_6 = arith.constant dense<0.000000e+00> : vector<4x8x8xf32>
    %17 = tpu.matmul %10, %13, %cst_6 {dimension_numbers = #tpu.dot_dimension_numbers<[2], [2], [0], [0], [0, 1, 0, 0, 1, 0], [1], [1]>} : vector<8x4x8xbf16>, vector<8x4x8xbf16>, vector<4x8x8xf32> -> vector<4x8x8xf32>
    "tpu.trace_stop"() : () -> ()
    %cst_7 = arith.constant 0.353553385 : f32
    %18 = vector.broadcast %cst_7 : f32 to vector<4x8x8xf32>
    %19 = arith.mulf %17, %18 : vector<4x8x8xf32>
    %cst_8 = arith.constant dense<0xFF800000> : vector<4x8xf32>
    %20 = vector.multi_reduction <maximumf>, %19, %cst_8 [2] : vector<4x8x8xf32> to vector<4x8xf32>
    %21 = vector.shape_cast %20 : vector<4x8xf32> to vector<4x8x1xf32>
    %22 = vector.broadcast %21 : vector<4x8x1xf32> to vector<4x8x8xf32>
    %23 = arith.subf %19, %22 : vector<4x8x8xf32>
    %24 = math.exp %23 : vector<4x8x8xf32>
    %cst_9 = arith.constant dense<0.000000e+00> : vector<4x8xf32>
    %25 = vector.multi_reduction <add>, %24, %cst_9 [2] : vector<4x8x8xf32> to vector<4x8xf32>
    %26 = vector.shape_cast %25 : vector<4x8xf32> to vector<4x8x1xf32>
    %27 = vector.broadcast %26 : vector<4x8x1xf32> to vector<4x8x8xf32>
    %28 = arith.divf %24, %27 : vector<4x8x8xf32>
    %29 = arith.truncf %28 : vector<4x8x8xf32> to vector<4x8x8xbf16>
    "tpu.trace_start"() <{level = 10 : i32, message = "nqk,knd->qnd"}> : () -> ()
    %cst_10 = arith.constant dense<0.000000e+00> : vector<4x8x8xf32>
    %30 = tpu.matmul %16, %29, %cst_10 {dimension_numbers = #tpu.dot_dimension_numbers<[0], [2], [2], [1], [0, 1, 0, 2, 1, 1], [1], [0]>} : vector<8x4x8xbf16>, vector<4x8x8xbf16>, vector<4x8x8xf32> -> vector<4x8x8xf32>
    %31 = tpu.transpose %30, [2, 0, 1] : vector<4x8x8xf32> -> vector<8x4x8xf32>
    "tpu.trace_stop"() : () -> ()
    %32 = vector.shape_cast %31 : vector<8x4x8xf32> to vector<8x32xf32>
    %c0_11 = arith.constant 0 : index
    %c0_12 = arith.constant 0 : index
    %33 = vector.load %arg7[%c0_11, %c0_12] : memref<8x32xf32, #tpu.memory_space<vmem>>, vector<8x32xf32>
    %34 = vector.extract_strided_slice %33 {offsets = [0, 0], sizes = [1, 32], strides = [1, 1]} : vector<8x32xf32> to vector<1x32xf32>
    %35 = vector.extract_strided_slice %33 {offsets = [1, 0], sizes = [1, 32], strides = [1, 1]} : vector<8x32xf32> to vector<1x32xf32>
    %36 = vector.extract_strided_slice %33 {offsets = [2, 0], sizes = [1, 32], strides = [1, 1]} : vector<8x32xf32> to vector<1x32xf32>
    %37 = vector.extract_strided_slice %33 {offsets = [3, 0], sizes = [1, 32], strides = [1, 1]} : vector<8x32xf32> to vector<1x32xf32>
    %38 = vector.extract_strided_slice %33 {offsets = [4, 0], sizes = [1, 32], strides = [1, 1]} : vector<8x32xf32> to vector<1x32xf32>
    %39 = vector.extract_strided_slice %33 {offsets = [5, 0], sizes = [1, 32], strides = [1, 1]} : vector<8x32xf32> to vector<1x32xf32>
    %40 = arith.truncf %32 : vector<8x32xf32> to vector<8x32xbf16>
    %c0_13 = arith.constant 0 : index
    %c0_14 = arith.constant 0 : index
    %41 = vector.load %arg3[%c0_13, %c0_14] : memref<32x32xbf16, #tpu.memory_space<vmem>>, vector<32x32xbf16>
    %cst_15 = arith.constant dense<0.000000e+00> : vector<8x32xf32>
    %42 = tpu.matmul %40, %41, %cst_15 {dimension_numbers = #tpu.dot_dimension_numbers<[1], [0], [0], [1], [0, 0, 1, 1], [], []>} : vector<8x32xbf16>, vector<32x32xbf16>, vector<8x32xf32> -> vector<8x32xf32>
    %43 = vector.broadcast %34 : vector<1x32xf32> to vector<8x32xf32>
    %44 = arith.addf %42, %43 : vector<8x32xf32>
    %45 = arith.addf %2, %44 : vector<8x32xf32>
    %cst_16 = arith.constant dense<0.000000e+00> : vector<8xf32>
    %46 = vector.multi_reduction <add>, %45, %cst_16 [1] : vector<8x32xf32> to vector<8xf32>
    %47 = vector.shape_cast %46 : vector<8xf32> to vector<8x1xf32>
    %cst_17 = arith.constant 3.200000e+01 : f32
    %48 = vector.broadcast %cst_17 : f32 to vector<8x1xf32>
    %49 = arith.divf %47, %48 : vector<8x1xf32>
    %50 = vector.broadcast %49 : vector<8x1xf32> to vector<8x32xf32>
    %51 = arith.subf %45, %50 : vector<8x32xf32>
    %52 = arith.mulf %51, %51 : vector<8x32xf32>
    %cst_18 = arith.constant dense<0.000000e+00> : vector<8xf32>
    %53 = vector.multi_reduction <add>, %52, %cst_18 [1] : vector<8x32xf32> to vector<8xf32>
    %54 = vector.shape_cast %53 : vector<8xf32> to vector<8x1xf32>
    %cst_19 = arith.constant 3.200000e+01 : f32
    %55 = vector.broadcast %cst_19 : f32 to vector<8x1xf32>
    %56 = arith.divf %54, %55 : vector<8x1xf32>
    %57 = vector.broadcast %49 : vector<8x1xf32> to vector<8x32xf32>
    %58 = arith.subf %45, %57 : vector<8x32xf32>
    %cst_20 = arith.constant 9.99999974E-6 : f32
    %59 = vector.broadcast %cst_20 : f32 to vector<8x1xf32>
    %60 = arith.addf %56, %59 : vector<8x1xf32>
    %61 = math.rsqrt %60 : vector<8x1xf32>
    %62 = vector.broadcast %61 : vector<8x1xf32> to vector<8x32xf32>
    %63 = arith.mulf %58, %62 : vector<8x32xf32>
    %64 = vector.broadcast %35 : vector<1x32xf32> to vector<8x32xf32>
    %65 = arith.mulf %63, %64 : vector<8x32xf32>
    %66 = vector.broadcast %36 : vector<1x32xf32> to vector<8x32xf32>
    %67 = arith.addf %65, %66 : vector<8x32xf32>
    %68 = arith.truncf %67 : vector<8x32xf32> to vector<8x32xbf16>
    %c0_21 = arith.constant 0 : index
    %c0_22 = arith.constant 0 : index
    %69 = vector.load %arg4[%c0_21, %c0_22] : memref<32x128xbf16, #tpu.memory_space<vmem>>, vector<32x128xbf16>
    %cst_23 = arith.constant dense<0.000000e+00> : vector<8x128xf32>
    %70 = tpu.matmul %68, %69, %cst_23 {dimension_numbers = #tpu.dot_dimension_numbers<[1], [0], [0], [1], [0, 0, 1, 1], [], []>} : vector<8x32xbf16>, vector<32x128xbf16>, vector<8x128xf32> -> vector<8x128xf32>
    %c0_24 = arith.constant 0 : index
    %c0_25 = arith.constant 0 : index
    %71 = vector.load %arg8[%c0_24, %c0_25] : memref<1x128xf32, #tpu.memory_space<vmem>>, vector<1x128xf32>
    %72 = vector.broadcast %71 : vector<1x128xf32> to vector<8x128xf32>
    %73 = arith.addf %70, %72 : vector<8x128xf32>
    %cst_26 = arith.constant 0.000000e+00 : f32
    %74 = vector.broadcast %cst_26 : f32 to vector<8x128xf32>
    %75 = arith.maximumf %73, %74 : vector<8x128xf32>
    %76 = arith.truncf %75 : vector<8x128xf32> to vector<8x128xbf16>
    %c0_27 = arith.constant 0 : index
    %c0_28 = arith.constant 0 : index
    %77 = vector.load %arg5[%c0_27, %c0_28] : memref<128x32xbf16, #tpu.memory_space<vmem>>, vector<128x32xbf16>
    %cst_29 = arith.constant dense<0.000000e+00> : vector<8x32xf32>
    %78 = tpu.matmul %76, %77, %cst_29 {dimension_numbers = #tpu.dot_dimension_numbers<[1], [0], [0], [1], [0, 0, 1, 1], [], []>} : vector<8x128xbf16>, vector<128x32xbf16>, vector<8x32xf32> -> vector<8x32xf32>
    %79 = vector.broadcast %37 : vector<1x32xf32> to vector<8x32xf32>
    %80 = arith.addf %78, %79 : vector<8x32xf32>
    %81 = arith.addf %67, %80 : vector<8x32xf32>
    %cst_30 = arith.constant dense<0.000000e+00> : vector<8xf32>
    %82 = vector.multi_reduction <add>, %81, %cst_30 [1] : vector<8x32xf32> to vector<8xf32>
    %83 = vector.shape_cast %82 : vector<8xf32> to vector<8x1xf32>
    %cst_31 = arith.constant 3.200000e+01 : f32
    %84 = vector.broadcast %cst_31 : f32 to vector<8x1xf32>
    %85 = arith.divf %83, %84 : vector<8x1xf32>
    %86 = vector.broadcast %85 : vector<8x1xf32> to vector<8x32xf32>
    %87 = arith.subf %81, %86 : vector<8x32xf32>
    %88 = arith.mulf %87, %87 : vector<8x32xf32>
    %cst_32 = arith.constant dense<0.000000e+00> : vector<8xf32>
    %89 = vector.multi_reduction <add>, %88, %cst_32 [1] : vector<8x32xf32> to vector<8xf32>
    %90 = vector.shape_cast %89 : vector<8xf32> to vector<8x1xf32>
    %cst_33 = arith.constant 3.200000e+01 : f32
    %91 = vector.broadcast %cst_33 : f32 to vector<8x1xf32>
    %92 = arith.divf %90, %91 : vector<8x1xf32>
    %93 = vector.broadcast %85 : vector<8x1xf32> to vector<8x32xf32>
    %94 = arith.subf %81, %93 : vector<8x32xf32>
    %cst_34 = arith.constant 9.99999974E-6 : f32
    %95 = vector.broadcast %cst_34 : f32 to vector<8x1xf32>
    %96 = arith.addf %92, %95 : vector<8x1xf32>
    %97 = math.rsqrt %96 : vector<8x1xf32>
    %98 = vector.broadcast %97 : vector<8x1xf32> to vector<8x32xf32>
    %99 = arith.mulf %94, %98 : vector<8x32xf32>
    %100 = vector.broadcast %38 : vector<1x32xf32> to vector<8x32xf32>
    %101 = arith.mulf %99, %100 : vector<8x32xf32>
    %102 = vector.broadcast %39 : vector<1x32xf32> to vector<8x32xf32>
    %103 = arith.addf %101, %102 : vector<8x32xf32>
    %104 = arith.truncf %103 : vector<8x32xf32> to vector<8x32xbf16>
    %c0_35 = arith.constant 0 : index
    %c0_36 = arith.constant 0 : index
    %c0_37 = arith.constant 0 : index
    %105 = vector.load %arg9[%c0_35, %c0_36, %c0_37] : memref<1x8x32xbf16, #tpu.memory_space<vmem>>, vector<1x8x32xbf16>
    %106 = vector.shape_cast %105 : vector<1x8x32xbf16> to vector<8x32xbf16>
    %107 = vector.shape_cast %104 : vector<8x32xbf16> to vector<1x8x32xbf16>
    tpu.vector_store %arg9[%c0_35, %c0_36, %c0_37], %107 {strides = array<i32>} : memref<1x8x32xbf16, #tpu.memory_space<vmem>>, vector<1x8x32xbf16>,
    return
  }
  func.func @transform_0(%arg0: i32) -> (i32, i32, i32) {
    %c0_i32 = arith.constant 0 : i32
    %c0_i32_0 = arith.constant 0 : i32
    %c0_i32_1 = arith.constant 0 : i32
    return %arg0, %c0_i32, %c0_i32_0 : i32, i32, i32
  }
  func.func @transform_1(%arg0: i32) -> (i32, i32) {
    %c0_i32 = arith.constant 0 : i32
    %c0_i32_0 = arith.constant 0 : i32
    %c0_i32_1 = arith.constant 0 : i32
    return %c0_i32, %c0_i32_0 : i32, i32
  }
  func.func @transform_2(%arg0: i32) -> (i32, i32) {
    %c0_i32 = arith.constant 0 : i32
    %c0_i32_0 = arith.constant 0 : i32
    %c0_i32_1 = arith.constant 0 : i32
    return %c0_i32, %c0_i32_0 : i32, i32
  }
  func.func @transform_3(%arg0: i32) -> (i32, i32) {
    %c0_i32 = arith.constant 0 : i32
    %c0_i32_0 = arith.constant 0 : i32
    %c0_i32_1 = arith.constant 0 : i32
    return %c0_i32, %c0_i32_0 : i32, i32
  }
  func.func @transform_4(%arg0: i32) -> (i32, i32) {
    %c0_i32 = arith.constant 0 : i32
    %c0_i32_0 = arith.constant 0 : i32
    %c0_i32_1 = arith.constant 0 : i32
    return %c0_i32, %c0_i32_0 : i32, i32
  }
  func.func @transform_5(%arg0: i32) -> (i32, i32) {
    %c0_i32 = arith.constant 0 : i32
    %c0_i32_0 = arith.constant 0 : i32
    %c0_i32_1 = arith.constant 0 : i32
    return %c0_i32, %c0_i32_0 : i32, i32
  }
  func.func @transform_6(%arg0: i32) -> (i32, i32) {
    %c0_i32 = arith.constant 0 : i32
    %c0_i32_0 = arith.constant 0 : i32
    %c0_i32_1 = arith.constant 0 : i32
    return %c0_i32, %c0_i32_0 : i32, i32
  }
  func.func @transform_7(%arg0: i32) -> (i32, i32) {
    %c0_i32 = arith.constant 0 : i32
    %c0_i32_0 = arith.constant 0 : i32
    %c0_i32_1 = arith.constant 0 : i32
    return %c0_i32, %c0_i32_0 : i32, i32
  }
  func.func @transform_8(%arg0: i32) -> (i32, i32, i32) {
    %c0_i32 = arith.constant 0 : i32
    %c0_i32_0 = arith.constant 0 : i32
    %c0_i32_1 = arith.constant 0 : i32
    return %arg0, %c0_i32, %c0_i32_0 : i32, i32, i32
  }
}

</mosaic_0001>

<bundles_post_ra>
// kernel: tpu_custom_call.1
= control target key start
LH: loop header
LB: loop body
LE: loop exit
PB: predicated region body
PF: predicated region fallthrough
CT: control target
= control target key end

     0   :  { %13 = vsyncpa [#allocation3], 0  ;;  %s3378_s0 = inlined_call_operand.vmem [shape: bf16[2,8,32], index: 0, kind: input, shape index: {}]   ;;  %s3379_s1 = inlined_call_operand.vmem [shape: bf16[32,96], index: 1, kind: input, shape index: {}]   ;;  %s3380_s2 = inlined_call_operand.vmem [shape: bf16[32,32], index: 2, kind: input, shape index: {}]   ;;  %s3381_s3 = inlined_call_operand.vmem [shape: bf16[32,128], index: 3, kind: input, shape index: {}]   ;;  %s3382_s4 = inlined_call_operand.vmem [shape: bf16[128,32], index: 4, kind: input, shape index: {}]   ;;  %s3383_s5 = inlined_call_operand.vmem [shape: f32[1,96], index: 5, kind: input, shape index: {}]   ;;  %s3384_s6 = inlined_call_operand.vmem [shape: f32[8,32], index: 6, kind: input, shape index: {}]   ;;  %s3385_s7 = inlined_call_operand.vmem [shape: f32[1,128], index: 7, kind: input, shape index: {}]   ;;  %s3386_s8 = inlined_call_operand.hbm [shape: bf16[2,8,32], index: 8, kind: output, shape index: {}]  }
   0x1   :  { %15 = vsyncpa [#allocation3 + $0x1], 0  ;;  %s2980_s27 = smov 0   ;;  %s2982_s28 = smov 0  }
   0x2   :  { %s2984_s29 = smov 0   ;;  %s2986_s30 = smov 0  }
   0x3 LB: > { %s3001_s9 = sadd.s32 4294967295, %s2919_s30   ;;  %s2601_s10 = sadd.s32 4294967294, %s2919_s30   ;;  %s2919_s30 = sphi %s2986_s30, %s3392_s30   ;;  %s2915_s29 = sphi %s2984_s29, %s3391_s29   ;;  %s2911_s28 = sphi %s2982_s28, %s3390_s28   ;;  %s2907_s27 = sphi %s2980_s27, %s3389_s27  }
   0x4   : > { %s3005_s11 = sadd.s32 1, %s2919_s30   ;;  %s201_s12 = sadd.s32 1, %s2915_s29 }
   0x5   : > { %s198_s13 = ssub.s32 %s2919_s30, %s3005_s11  ;;  %p211_p0 = scmp.ne.s32.totalorder %s2915_s29, %s2911_s28 }
   0x6   : > { %p199_p1 = scmp.eq.s32.totalorder %s198_s13, 0  ;;  %p212_p2 = scmp.eq.s32.totalorder %s3001_s9, 1 }
   0x7   : > { %p217_p3 = scmp.ne.s32.totalorder %s2911_s28, %s2907_s27  ;;  %p218_p4 = scmp.eq.s32.totalorder %s2601_s10, 1 }
   0x8   : > { %s3016_s14 = scalar_select %p199_p1, %s2915_s29, %s201_s12  }
   0x9   : > { %p3018_p5 = por %p212_p2, %p211_p0  ;;  %p3022_p6 = por %p218_p4, %p217_p3 }
   0xa   : > { %p2604_p7 = scmp.ge.s32.totalorder %s2919_s30, 1  ;;  %p264_p8 = scmp.lt.s32.totalorder %s2919_s30, 3 }
   0xc   : > { %p265_p9 = pnand %p2604_p7, %p264_p8 }
   0xd   : > { %v2822_v0 = vld [vmem:[%s3379_s1] sm:$0xff] (!%p265_p9)   ;;  %v2921_v1 = vmov (!%p265_p9), 0.0   ;;  %v2823_v2 = vld [vmem:[%s3379_s1 + $0x8] sm:$0xff] (!%p265_p9)   ;;  %vm2922_vm0 = vmmov (!%p265_p9), 0   ;;  %p297_p10 = scmp.lt.s32.totalorder (!%p265_p9), %s3001_s9, 1  ;;  %vm327_vm1 = vcmask (!%p265_p9), 261120   ;;  %v386_v15 = vlaneseq (!%p265_p9) }
   0xe   : > { %268 = sbr.rel (%p265_p9) target bundleno = 3160 (0xc58), region = 52  ;;  %2678 = vmatprep.subr.bf16.mxu1 (!%p265_p9), %v2921_v1  ;;  %2698 = vmatprep.subr.bf16.mxu0 (!%p265_p9), %v2921_v1  ;;  %v2607_v4 = vld [vmem:[%s3383_s5] ss:$0 sm:$0xff] (!%p265_p9)  ;;  %s2923_s12 = smov (!%p265_p9), 104   ;;  %v2927_v13 = vmov (!%p265_p9), 1983009808  }
   0xf   : > { %2679 = vmatpush3.bf16.msra.mxu1 (!%p265_p9), %v2822_v0  ;;  %2682 = vmatprep.mubr.msk.bf16.mxu1 (!%p265_p9), %vm2922_vm0, %v2921_v1  ;;  %s2924_s13 = smov (!%p265_p9), 120   ;;  %s2925_s17 = smov (!%p265_p9), 96   ;;  %v384_v14 = vunpack.c.l.s4 (!%p265_p9), %v2927_v13  ;;  %v3071_v17 = vshrl.u32 (!%p265_p9), %v386_v15, 7  ;;  %v2928_v19 = vmov (!%p265_p9), 1934713408   ;;  %vm1117_vm2 = vcmask (!%p265_p9), 1043456  }
  0x10   : > { %2680 = vmatprep.subr.bf16.mxu1 (!%p265_p9), %v2921_v1  ;;  %2700 = vmatprep.mubr.msk.bf16.mxu0 (!%p265_p9), %vm2922_vm0, %v2921_v1  ;;  %s2926_s18 = smov (!%p265_p9), 112   ;;  %v416_v20 = vunpack.c.l.s4 (!%p265_p9), %v2928_v19  ;;  %s2930_s19 = smov (!%p265_p9), 64   ;;  %vm1113_vm3 = vcmask (!%p265_p9), 64512   ;;  %vm2230_vm4 = vcmask (!%p265_p9), 130048   ;;  %vm2232_vm5 = vcmask (!%p265_p9), 195584  }
  0x11   : > { %v385_v16 = vunpack.c.0.s8 (!%p265_p9), %v384_v14  ;;  %s2931_s24 = smov (!%p265_p9), 16   ;;  %s2932_s26 = smov (!%p265_p9), 8   ;;  %vm2526_vm6 = vcmask (!%p265_p9), 257024  }
  0x12   : > { %v417_v23 = vunpack.c.0.s8 (!%p265_p9), %v416_v20  ;;  %s2933_s10 = smov (!%p265_p9), 24  }
  0x13   : > { %2681 = vmatpush3.bf16.msra.mxu1 (!%p265_p9), %v2823_v2  ;;  %v3074_v22 = vsub.s32 (!%p265_p9), %v385_v16, %v3071_v17 }
  0x14   : > { %2686 = vmatprep.subr.bf16.mxu1 (!%p265_p9), %v2921_v1  ;;  %v3081_v34 = vsub.s32 (!%p265_p9), %v417_v23, %v3071_v17 }
  0x15   : > { %s298_s21 = scalar_select %p297_p10, %s3001_s9, 1 }
  0x17   : > { %s2606_s22 = sshll.u32 %s298_s21, 2 }
  0x18   : > { %s3046_s25 = scalar_lea.vmem %s3378_s0, %s2606_s22 }
  0x19   : > { %v302_v3 = vld [vmem:[%s3046_s25] sm:$0xf] }
  0x1a   : > { %2683 = vmatmul.mubr.msk.bf16.vlgmr.msra.gmra.mrb[0].mxu1 %vm327_vm1, %v302_v3 }
  0x1b   : > { %2688 = vmatprep.mubr.msk.bf16.mxu1 %vm2922_vm0, %v2921_v1 }
  0xed   : > { %v365_v5 = vpop.f32.mrb[0].mxu1 }
  0xee   : > { %v3056_v6 = vadd.f32 %v2607_v4, %v365_v5  ;;  %v2684_v7 = vpop.f32.mrb[1].mxu1 }
  0xef   : > { %v368_v8 = vpop.f32.mrb[2].mxu1 }
  0xf0   : > { %378 = vrot.lane.b32.xlu1 %v3056_v6, %s2923_s12  ;;  %372 = vrot.lane.b32.xlu0 %v3056_v6, %s2924_s13  ;;  %v2685_v9 = vpop.f32.mrb[3].mxu1  ;;  %s2641_s12 = sshll.u32 %s3001_s9, 6  ;;  %s2934_s9 = smov [#allocation2]  }
  0xf1   : > { %s2861_s22 = sshll.u32 %s2934_s9, 4  ;;  %s2862_s22 = int_to_ptr.vmem [resolvable:$false] %s2861_s22 }
  0xf2   : > { %s2863_s23 = scalar_lea.vmem %s2862_s22, 128 }
  0xf4   : > { %457 = vrot.lane.b32.xlu1 %v3056_v6, %s2925_s17  ;;  %375 = vrot.lane.b32.xlu0 %v3056_v6, %s2926_s18 }
 0x162   : > { %v3062_v10 = vpop.permute.xlu0 %372  ;;  %v3065_v11 = vpop.permute.xlu1 %378 }
 0x163   : > { %459 = vrot.lane.b32.xlu0 %v3062_v10, %s2925_s17 }
 0x166   : > { %v3067_v12 = vpop.permute.xlu0 %375  ;;  %v458_v18 = vpop.permute.xlu1 %457 }
 0x167   : > { %463 = vrot.lane.b32.xlu0 %v3065_v11, %s2925_s17  ;;  %461 = vrot.lane.b32.xlu1 %v3067_v12, %s2925_s17 }
 0x1d5   : > { %v460_v21 = vpop.permute.xlu0 %459 }
 0x1d9   : > { %v462_v24 = vpop.permute.xlu1 %461  ;;  %v464_v25 = vpop.permute.xlu0 %463 }
 0x1da   : > { %v469_v26 = vcombine.low %v458_v18, %v462_v24  ;;  %v470_v27 = vcombine.high %v458_v18, %v462_v24  ;;  %v485_v28 = vcombine.low %v460_v21, %v464_v25  ;;  %v486_v29 = vcombine.high %v460_v21, %v464_v25 }
 0x1dc   : > { %v477_v30 = vrot.slane %v469_v26, %v3074_v22  ;;  %v484_v31 = vrot.slane %v470_v27, %v3074_v22  ;;  %v493_v32 = vrot.slane %v485_v28, %v3074_v22  ;;  %v500_v33 = vrot.slane %v486_v29, %v3074_v22 }
 0x1dd   : > { %v2929_v28 = vmov 0  }
 0x1de   : > { %v502_v35 = vcombine.high %v477_v30, %v493_v32  ;;  %v501_v36 = vcombine.low %v477_v30, %v493_v32  ;;  %v517_v37 = vcombine.low %v484_v31, %v500_v33  ;;  %v518_v40 = vcombine.high %v484_v31, %v500_v33 }
 0x1e0   : > { %v516_v38 = vrot.slane %v502_v35, %v3081_v34  ;;  %v509_v39 = vrot.slane %v501_v36, %v3081_v34  ;;  %v525_v43 = vrot.slane %v517_v37, %v3081_v34  ;;  %v532_v45 = vrot.slane %v518_v40, %v3081_v34 }
 0x1e2   : > { %v539_v41 = vpack.c.bf16 %v516_v38, %v516_v38  ;;  %v537_v42 = vpack.c.bf16 %v509_v39, %v509_v39  ;;  %v534_v44 = vcombine.high %v516_v38, %v2921_v1  ;;  %v541_v46 = vpack.c.bf16 %v525_v43, %v525_v43 }
 0x1e3   : > { %v535_v48 = vcombine.high %v525_v43, %v2921_v1  ;;  %v533_v49 = vcombine.high %v509_v39, %v2921_v1  ;;  %v536_v52 = vcombine.high %v532_v45, %v2921_v1  ;;  %v543_v54 = vpack.c.bf16 %v532_v45, %v532_v45 }
 0x1e4   : > { %727 = vxpose.xlu0.c.b16.start.end [1/1] (short) (narrow) %v539_v41, 16  ;;  %695 = vxpose.xlu1.c.b16.start.end [1/1] (short) (narrow) %v537_v42, 16  ;;  %v540_v47 = vpack.c.bf16 %v534_v44, %v534_v44  ;;  %v381_v44 = vcombine.low %v3056_v6, %v3067_v12  ;;  %v382_v45 = vcombine.high %v3056_v6, %v3067_v12 }
 0x1e5   : > { %v542_v50 = vpack.c.bf16 %v535_v48, %v535_v48  ;;  %v538_v51 = vpack.c.bf16 %v533_v49, %v533_v49  ;;  %v544_v53 = vpack.c.bf16 %v536_v52, %v536_v52 }
 0x1e6   : > { %v389_v48 = vrot.slane %v381_v44, %v3074_v22  ;;  %v396_v49 = vrot.slane %v382_v45, %v3074_v22 }
 0x1e8   : > { %759 = vxpose.xlu0.c.b16.start.end [1/1] (short) (narrow) %v541_v46, 16  ;;  %743 = vxpose.xlu1.c.b16.start.end [1/1] (short) (narrow) %v540_v47, 16  ;;  %v397_v46 = vcombine.low %v3062_v10, %v3065_v11  ;;  %v398_v47 = vcombine.high %v3062_v10, %v3065_v11 }
 0x1ec   : > { %775 = vxpose.xlu1.c.b16.start.end [1/1] (short) (narrow) %v542_v50, 16  ;;  %711 = vxpose.xlu0.c.b16.start.end [1/1] (short) (narrow) %v538_v51, 16  ;;  %v405_v50 = vrot.slane %v397_v46, %v3074_v22  ;;  %v412_v51 = vrot.slane %v398_v47, %v3074_v22 }
 0x1ee   : > { %v413_v52 = vcombine.low %v389_v48, %v405_v50 }
 0x1f0   : > { %807 = vxpose.xlu1.c.b16.start.end [1/1] (short) (narrow) %v544_v53, 16  ;;  %791 = vxpose.xlu0.c.b16.start.end [1/1] (short) (narrow) %v543_v54, 16  ;;  %v414_v53 = vcombine.high %v389_v48, %v405_v50  ;;  %v429_v54 = vcombine.low %v396_v49, %v412_v51 }
 0x24a   : > { %v735_v55 = vpop.trf.xlu0  ;;  %v703_v56 = vpop.trf.xlu1 }
 0x24e   : > { %v767_v57 = vpop.trf.xlu0  ;;  %v751_v58 = vpop.trf.xlu1 }
 0x24f   : > { %v823_v61 = vcombine.low %v703_v56, %v767_v57  ;;  %v437_v57 = vrot.slane %v429_v54, %v3081_v34 }
 0x251   : > { %v830_v4 = vrot.slane %v823_v61, %v3074_v22  ;;  %v447_v61 = vcombine.high %v437_v57, %v2921_v1 }
 0x252   : > { %v783_v59 = vpop.trf.xlu1  ;;  %v719_v60 = vpop.trf.xlu0 }
 0x253   : > { %v857_v62 = vcombine.low %v719_v60, %v783_v59 }
 0x255   : > { %v864_v5 = vrot.slane %v857_v62, %v3074_v22 }
 0x256   : > { %v815_v63 = vpop.trf.xlu1  ;;  %v799_v0 = vpop.trf.xlu0 }
 0x257   : > { %v865_v2 = vcombine.low %v751_v58, %v815_v63  ;;  %v831_v3 = vcombine.low %v735_v55, %v799_v0  ;;  %v430_v55 = vcombine.high %v396_v49, %v412_v51 }
 0x259   : > { %v872_v7 = vrot.slane %v865_v2, %v3074_v22  ;;  %v838_v8 = vrot.slane %v831_v3, %v3074_v22 }
 0x25b   : > { %v873_v9 = vcombine.low %v864_v5, %v872_v7  ;;  %v874_v13 = vcombine.high %v864_v5, %v872_v7  ;;  %v839_v14 = vcombine.low %v830_v4, %v838_v8  ;;  %v840_v15 = vcombine.high %v830_v4, %v838_v8 }
 0x25d   : > { %v847_v16 = vrot.slane %v839_v14, %v3081_v34  ;;  %v881_v18 = vrot.slane %v873_v9, %v3081_v34  ;;  %v854_v19 = vrot.slane %v840_v15, %v3081_v34  ;;  %v888_v20 = vrot.slane %v874_v13, %v3081_v34 }
 0x25f   : > { %v893_v21 = vpack.i.b16 %v881_v18, %v847_v16  ;;  %v895_v23 = vshrl.u32 %v847_v16, 16  ;;  %v896_v24 = vshrl.u32 %v881_v18, 16  ;;  %v911_v25 = vshrl.u32 %v854_v19, 16 }
 0x260   : > { %v912_v27 = vshrl.u32 %v888_v20, 16  ;;  %v855_v29 = vcombine.high %v847_v16, %v2929_v28  ;;  %v889_v30 = vcombine.high %v881_v18, %v2929_v28  ;;  %v909_v31 = vpack.i.b16 %v888_v20, %v854_v19 }
 0x261   : > { %923 = vxpose.xlu0.c.b16.start.end [1/1] (short) (narrow) %v893_v21, 16  ;;  %v897_v26 = vpack.i.b16 %v896_v24, %v895_v23  ;;  %v856_v32 = vcombine.high %v854_v19, %v2929_v28  ;;  %v890_v37 = vcombine.high %v888_v20, %v2929_v28 }
 0x262   : > { %v913_v33 = vpack.i.b16 %v912_v27, %v911_v25  ;;  %v903_v35 = vshrl.u32 %v855_v29, 16  ;;  %v904_v36 = vshrl.u32 %v889_v30, 16  ;;  %v901_v38 = vpack.i.b16 %v889_v30, %v855_v29 }
 0x263   : > { %939 = vxpose.xlu1.c.b16.start.end [1/1] (short) (narrow) %v897_v26, 16  ;;  %v919_v40 = vshrl.u32 %v856_v32, 16  ;;  %v920_v41 = vshrl.u32 %v890_v37, 16  ;;  %v917_v42 = vpack.i.b16 %v890_v37, %v856_v32 }
 0x264   : > { %v905_v39 = vpack.i.b16 %v904_v36, %v903_v35 }
 0x265   : > { %987 = vxpose.xlu0.c.b16.start.end [1/1] (short) (narrow) %v909_v31, 16  ;;  %v921_v43 = vpack.i.b16 %v920_v41, %v919_v40 }
 0x267   : > { %1003 = vxpose.xlu1.c.b16.start.end [1/1] (short) (narrow) %v913_v33, 16 }
 0x269   : > { %955 = vxpose.xlu0.c.b16.start.end [1/1] (short) (narrow) %v901_v38, 16 }
 0x26b   : > { %971 = vxpose.xlu1.c.b16.start.end [1/1] (short) (narrow) %v905_v39, 16 }
 0x26d   : > { %1019 = vxpose.xlu0.c.b16.start.end [1/1] (short) (narrow) %v917_v42, 16 }
 0x26f   : > { %1035 = vxpose.xlu1.c.b16.start.end [1/1] (short) (narrow) %v921_v43, 16 }
 0x273   : > { %547 = vrot.lane.b32.xlu1 %v3062_v10, %s2930_s19  ;;  %v444_v10 = vrot.slane %v430_v55, %v3081_v34 }
 0x275   : > { %v448_v62 = vcombine.high %v444_v10, %v2921_v1 }
 0x276   : > { %545 = vrot.lane.b32.xlu0 %v3056_v6, %s2930_s19  ;;  %v421_v6 = vrot.slane %v413_v52, %v3081_v34 }
 0x277   : > { %549 = vrot.lane.b32.xlu1 %v3067_v12, %s2930_s19  ;;  %v428_v12 = vrot.slane %v414_v53, %v3081_v34 }
 0x278   : > { %v445_v59 = vcombine.high %v421_v6, %v2921_v1  ;;  %v2611_v4 = vpack.c.bf16 %v437_v57, %v421_v6 }
 0x279   : > { %v446_v60 = vcombine.high %v428_v12, %v2921_v1  ;;  %v2612_v5 = vpack.c.bf16 %v444_v10, %v428_v12 }
 0x27a   : > { %551 = vrot.lane.b32.xlu0 %v3065_v11, %s2930_s19  ;;  %v2613_v2 = vpack.c.bf16 %v447_v61, %v445_v59  ;;  %v640_v18 = vrot.slane %v2611_v4, %v3074_v22  ;;  %s3336_s19 = scalar_lea.hbm %s3386_s8, %s2641_s12 }
 0x27b   : > { %v2614_v3 = vpack.c.bf16 %v448_v62, %v446_v60  ;;  %v648_v19 = vrot.slane %v2612_v5, %v3074_v22 }
 0x27c   : > { %v665_v13 = vrot.slane %v2613_v2, %v3074_v22 }
 0x27d   : > { %v673_v14 = vrot.slane %v2614_v3, %v3074_v22  ;;  %v649_v30 = vcombine.low %v640_v18, %v648_v19 }
 0x27f   : > { %v674_v29 = vcombine.low %v665_v13, %v673_v14  ;;  %v656_v37 = vrot.slane %v649_v30, %v3081_v34 }
 0x281   : > { %v681_v35 = vrot.slane %v674_v29, %v3081_v34  ;;  %v657_v48 = vcombine.high %v656_v37, %v2929_v28  ;;  %v686_v54 = vshrl.u32 %v656_v37, 16 }
 0x283   : > { %v682_v45 = vcombine.high %v681_v35, %v2929_v28  ;;  %v685_v47 = vpack.i.b16 %v681_v35, %v656_v37  ;;  %v687_v53 = vshrl.u32 %v681_v35, 16  ;;  %v692_v57 = vshrl.u32 %v657_v48, 16 }
 0x285   : > { %v691_v51 = vpack.i.b16 %v682_v45, %v657_v48  ;;  %v693_v12 = vshrl.u32 %v682_v45, 16 }
 0x287   : > { %v694_v10 = vpack.i.b16 %v693_v12, %v692_v57 }
 0x2c7   : > { %v931_v56 = vpop.trf.xlu0 }
 0x2c9   : > { %v947_v11 = vpop.trf.xlu1 }
 0x2cb   : > { %v995_v58 = vpop.trf.xlu0 }
 0x2cc   : > { %v1051_v8 = vcombine.low %v931_v56, %v995_v58  ;;  %v688_v56 = vpack.i.b16 %v687_v53, %v686_v54 }
 0x2cd   : > { %v1011_v63 = vpop.trf.xlu1 }
 0x2ce   : > { %v1076_v15 = vcombine.low %v947_v11, %v1011_v63  ;;  %v1058_v21 = vrot.slane %v1051_v8, %v3074_v22 }
 0x2cf   : > { %v963_v0 = vpop.trf.xlu0 }
 0x2d0   : > { %v1083_v25 = vrot.slane %v1076_v15, %v3074_v22 }
 0x2d1   : > { %v979_v7 = vpop.trf.xlu1 }
 0x2d3   : > { %v1027_v9 = vpop.trf.xlu0 }
 0x2d4   : > { %v1059_v16 = vcombine.low %v963_v0, %v1027_v9 }
 0x2d5   : > { %v1043_v20 = vpop.trf.xlu1 }
 0x2d6   : > { %v1066_v23 = vrot.slane %v1059_v16, %v3074_v22  ;;  %v1084_v24 = vcombine.low %v979_v7, %v1043_v20 }
 0x2d8   : > { %v1067_v26 = vcombine.low %v1058_v21, %v1066_v23  ;;  %v1091_v27 = vrot.slane %v1084_v24, %v3074_v22 }
 0x2da   : > { %v1074_v31 = vrot.slane %v1067_v26, %v3081_v34  ;;  %v1092_v32 = vcombine.low %v1083_v25, %v1091_v27 }
 0x2dc   : > { %v1099_v33 = vrot.slane %v1092_v32, %v3081_v34  ;;  %v1075_v36 = vcombine.high %v1074_v31, %v2929_v28  ;;  %v1104_v40 = vshrl.u32 %v1074_v31, 16 }
 0x2de   : > { %v1103_v38 = vpack.i.b16 %v1099_v33, %v1074_v31  ;;  %v1100_v39 = vcombine.high %v1099_v33, %v2929_v28  ;;  %v1105_v41 = vshrl.u32 %v1099_v33, 16  ;;  %v1110_v52 = vshrl.u32 %v1075_v36, 16 }
 0x2e0   : > { %v1119_v42 = vsel %vm1117_vm2, %v1103_v38, 0  ;;  %v1109_v43 = vpack.i.b16 %v1100_v39, %v1075_v36  ;;  %v1106_v44 = vpack.i.b16 %v1105_v41, %v1104_v40  ;;  %v1111_v49 = vshrl.u32 %v1100_v39, 16 }
 0x2e1   : > { %2687 = vmatpush3.bf16.msra.mxu1 %v1119_v42 }
 0x2e2   : > { %v1211_v46 = vsel %vm1117_vm2, %v1109_v43, 0  ;;  %2692 = vmatprep.subr.bf16.mxu1 %v2921_v1  ;;  %v1165_v50 = vsel %vm1117_vm2, %v1106_v44, 0  ;;  %v1112_v55 = vpack.i.b16 %v1111_v49, %v1110_v52 }
 0x2e3   : > { %2699 = vmatpush3.bf16.msra.mxu0 %v1211_v46 }
 0x2e4   : > { %2689 = vmatmul.mubr.msk.bf16.vlgmr.msra.gmra.mrb[4].mxu1 %vm1113_vm3, %v685_v47  ;;  %2710 = vmatprep.subr.bf16.mxu0 %v2921_v1  ;;  %v1257_v6 = vsel %vm1117_vm2, %v1112_v55, 0 }
 0x2e5   : > { %2693 = vmatpush3.bf16.msra.mxu1 %v1165_v50  ;;  %2694 = vmatprep.mubr.msk.bf16.mxu1 %vm2922_vm0, %v2921_v1  ;;  %v548_v23 = vpop.permute.xlu1 %547 }
 0x2e6   : > { %2701 = vmatmul.mubr.msk.bf16.vlgmr.msra.gmra.mrb[0].mxu0 %vm1113_vm3, %v691_v51  ;;  %2704 = vmatprep.subr.bf16.mxu1 %v2921_v1 }
 0x2e7   : > { %2712 = vmatprep.mubr.msk.bf16.mxu0 %vm2922_vm0, %v2921_v1 }
 0x2e8   : > { %v546_v21 = vpop.permute.xlu0 %545 }
 0x2e9   : > { %v550_v25 = vpop.permute.xlu1 %549 }
 0x2ea   : > { %v557_v27 = vcombine.low %v546_v21, %v550_v25  ;;  %v558_v35 = vcombine.high %v546_v21, %v550_v25 }
 0x2ec   : > { %2695 = vmatmul.mubr.msk.bf16.vlgmr.msra.gmra.mrb[8].mxu1 %vm1113_vm3, %v688_v56  ;;  %v552_v24 = vpop.permute.xlu0 %551  ;;  %v565_v30 = vrot.slane %v557_v27, %v3074_v22  ;;  %v572_v39 = vrot.slane %v558_v35, %v3074_v22 }
 0x2ed   : > { %2705 = vmatpush3.bf16.msra.mxu1 %v1257_v6  ;;  %2706 = vmatprep.mubr.msk.bf16.mxu1 %vm2922_vm0, %v2921_v1  ;;  %v573_v26 = vcombine.low %v548_v23, %v552_v24  ;;  %v574_v32 = vcombine.high %v548_v23, %v552_v24 }
 0x2ee   : > { %2716 = vmatprep.subr.bf16.mxu1 %v2921_v1 }
 0x2ef   : > { %v581_v29 = vrot.slane %v573_v26, %v3074_v22  ;;  %v588_v36 = vrot.slane %v574_v32, %v3074_v22 }
 0x2f1   : > { %v589_v31 = vcombine.low %v565_v30, %v581_v29  ;;  %v590_v38 = vcombine.high %v565_v30, %v581_v29  ;;  %v605_v42 = vcombine.low %v572_v39, %v588_v36  ;;  %v606_v46 = vcombine.high %v572_v39, %v588_v36 }
 0x2f3   : > { %v597_v33 = vrot.slane %v589_v31, %v3081_v34  ;;  %v604_v41 = vrot.slane %v590_v38, %v3081_v34  ;;  %v613_v45 = vrot.slane %v605_v42, %v3081_v34  ;;  %v620_v48 = vrot.slane %v606_v46, %v3081_v34 }
 0x2f4   : > { %2707 = vmatmul.mubr.msk.bf16.vlgmr.msra.gmra.mrb[12].mxu1 %vm1113_vm3, %v694_v10 }
 0x2f5   : > { %2718 = vmatprep.mubr.msk.bf16.mxu1 %vm2922_vm0, %v2921_v1  ;;  %v621_v37 = vcombine.high %v597_v33, %v2921_v1  ;;  %v627_v43 = vpack.c.bf16 %v604_v41, %v604_v41  ;;  %v625_v44 = vpack.c.bf16 %v597_v33, %v597_v33  ;;  %v629_v47 = vpack.c.bf16 %v613_v45, %v613_v45 }
 0x2f6   : > { %v631_v49 = vpack.c.bf16 %v620_v48, %v620_v48  ;;  %v622_v52 = vcombine.high %v604_v41, %v2921_v1  ;;  %v623_v54 = vcombine.high %v613_v45, %v2921_v1  ;;  %v624_v56 = vcombine.high %v620_v48, %v2921_v1 }
 0x2f7   : > { %v626_v40 = vpack.c.bf16 %v621_v37, %v621_v37 }
 0x2f8   : > { %v628_v53 = vpack.c.bf16 %v622_v52, %v622_v52  ;;  %v630_v55 = vpack.c.bf16 %v623_v54, %v623_v54  ;;  %v632_v6 = vpack.c.bf16 %v624_v56, %v624_v56 }
 0x3b7   : > { %v1155_v11 = vpop.f32.mrb[4].mxu1 }
 0x3b8   : > { %v3163_v58 = vmul.f32 0.35355338, %v1155_v11  ;;  %v2690_v59 = vpop.f32.mrb[5].mxu1 }
 0x3b9   : > { %v1158_v60 = vpop.f32.mrb[6].mxu1  ;;  %v1247_v61 = vpop.f32.mrb[0].mxu0 }
 0x3ba   : > { %v3165_v62 = vmul.f32 0.35355338, %v1247_v61  ;;  %v2691_v63 = vpop.f32.mrb[7].mxu1  ;;  %v2702_v0 = vpop.f32.mrb[1].mxu0  ;;  %v1303_v2 = vsel %vm1113_vm3, %v3163_v58, -inf }
 0x3bb   : > { %v1250_v3 = vpop.f32.mrb[2].mxu0  ;;  %1304 = vmax.xlane.f32.xlu0 %v1303_v2 }
 0x3bc   : > { %v2703_v4 = vpop.f32.mrb[3].mxu0  ;;  %v1309_v5 = vsel %vm1113_vm3, %v3165_v62, -inf }
 0x3bf   : > { %1310 = vmax.xlane.f32.xlu0 %v1309_v5  ;;  %v1201_v7 = vpop.f32.mrb[8].mxu1 }
 0x3c0   : > { %v3171_v8 = vmul.f32 0.35355338, %v1201_v7  ;;  %v2696_v9 = vpop.f32.mrb[9].mxu1 }
 0x3c1   : > { %v1204_v13 = vpop.f32.mrb[10].mxu1 }
 0x3c2   : > { %v2697_v14 = vpop.f32.mrb[11].mxu1  ;;  %v1306_v15 = vsel %vm1113_vm3, %v3171_v8, -inf }
 0x3c3   : > { %1307 = vmax.xlane.f32.xlu1 %v1306_v15 }
 0x3c7   : > { %v1293_v16 = vpop.f32.mrb[12].mxu1 }
 0x3c8   : > { %v2708_v18 = vpop.f32.mrb[13].mxu1  ;;  %v3184_v50 = vmul.f32 0.35355338, %v1293_v16 }
 0x3c9   : > { %v1296_v19 = vpop.f32.mrb[14].mxu1 }
 0x3ca   : > { %v2709_v20 = vpop.f32.mrb[15].mxu1  ;;  %v1312_v51 = vsel %vm1113_vm3, %v3184_v50, -inf }
 0x3ec   : > { %1367 = vxpose.xlu0.c.b16.start.end [1/1] (short) (narrow) %v626_v40, 16 }
 0x3f0   : > { %1383 = vxpose.xlu0.c.b16.start.end [1/1] (short) (narrow) %v627_v43, 16  ;;  %1351 = vxpose.xlu1.c.b16.start.end [1/1] (short) (narrow) %v625_v44, 16 }
 0x3f4   : > { %1415 = vxpose.xlu0.c.b16.start.end [1/1] (short) (narrow) %v629_v47, 16 }
 0x3f8   : > { %1447 = vxpose.xlu0.c.b16.start.end [1/1] (short) (narrow) %v631_v49, 16 }
 0x3fd   : > { %1313 = vmax.xlane.f32.xlu1 %v1312_v51 }
 0x42a   : > { %1399 = vxpose.xlu1.c.b16.start.end [1/1] (short) (narrow) %v628_v53, 16 }
 0x42e   : > { %1431 = vxpose.xlu1.c.b16.start.end [1/1] (short) (narrow) %v630_v55, 16 }
 0x432   : > { %1463 = vxpose.xlu1.c.b16.start.end [1/1] (short) (narrow) %v632_v6, 16 }
 0x448   : > { %v1305_v12 = vpop.xlane.xlu0 %1304 }
 0x449   : > { %v1315_v32 = vsub.f32 %v3163_v58, %v1305_v12 }
 0x44b   : > { %v1319_v41 = vmul.f32 1.442695, %v1315_v32 }
 0x44c   : > { %v1311_v57 = vpop.xlane.xlu0 %1310 }
 0x44d   : > { %v1317_v42 = vsub.f32 %v3165_v62, %v1311_v57  ;;  %2836 = vpow2.f32 %v1319_v41 }
 0x44f   : > { %v1323_v48 = vmul.f32 1.442695, %v1317_v42 }
 0x450   : > { %v1308_v59 = vpop.xlane.xlu1 %1307 }
 0x451   : > { %v1316_v37 = vsub.f32 %v3171_v8, %v1308_v59 }
 0x452   : > { %v1375_v10 = vpop.trf.xlu0 }
 0x453   : > { %v1321_v45 = vmul.f32 1.442695, %v1316_v37 }
 0x455   : > { %2838 = vpow2.f32 %v1321_v45 }
 0x456   : > { %v1391_v11 = vpop.trf.xlu0  ;;  %v1359_v60 = vpop.trf.xlu1  ;;  %2840 = vpow2.f32 %v1323_v48 }
 0x457   : > { %v2837_v51 = vpop.eup %2836 }
 0x458   : > { %v1327_v52 = vsel %vm1113_vm3, %v2837_v51, 0.0 }
 0x45a   : > { %v1423_v61 = vpop.trf.xlu0 }
 0x45b   : > { %v1479_v2 = vcombine.low %v1359_v60, %v1423_v61 }
 0x45d   : > { %v1486_v5 = vrot.slane %v1479_v2, %v3074_v22 }
 0x45e   : > { %v1455_v0 = vpop.trf.xlu0 }
 0x45f   : > { %v1487_v3 = vcombine.low %v1391_v11, %v1455_v0  ;;  %v2839_v62 = vpop.eup %2838 }
 0x460   : > { %v2841_v53 = vpop.eup %2840 }
 0x461   : > { %v1494_v7 = vrot.slane %v1487_v3, %v3074_v22  ;;  %v1333_v55 = vsel %vm1113_vm3, %v2841_v53, 0.0 }
 0x463   : > { %v1495_v14 = vcombine.low %v1486_v5, %v1494_v7  ;;  %v1496_v25 = vcombine.high %v1486_v5, %v1494_v7 }
 0x465   : > { %v1503_v20 = vrot.slane %v1495_v14, %v3081_v34  ;;  %v1510_v40 = vrot.slane %v1496_v25, %v3081_v34 }
 0x467   : > { %v1551_v26 = vshrl.u32 %v1503_v20, 16  ;;  %v1511_v30 = vcombine.high %v1503_v20, %v2929_v28  ;;  %v1567_v47 = vshrl.u32 %v1510_v40, 16  ;;  %v1512_v12 = vcombine.high %v1510_v40, %v2929_v28 }
 0x469   : > { %v1559_v39 = vshrl.u32 %v1511_v30, 16  ;;  %v1575_v11 = vshrl.u32 %v1512_v12, 16 }
 0x48a   : > { %v1314_v63 = vpop.xlane.xlu1 %1313 }
 0x48b   : > { %v1318_v58 = vsub.f32 %v3184_v50, %v1314_v63  ;;  %v1330_v50 = vsel %vm1113_vm3, %v2839_v62, 0.0 }
 0x48d   : > { %v1325_v49 = vmul.f32 1.442695, %v1318_v58 }
 0x48f   : > { %2842 = vpow2.f32 %v1325_v49 }
 0x490   : > { %v1407_v4 = vpop.trf.xlu1 }
 0x494   : > { %v1439_v9 = vpop.trf.xlu1 }
 0x495   : > { %v1513_v13 = vcombine.low %v1375_v10, %v1439_v9 }
 0x497   : > { %v1520_v18 = vrot.slane %v1513_v13, %v3074_v22 }
 0x498   : > { %v1471_v15 = vpop.trf.xlu1 }
 0x499   : > { %v1521_v16 = vcombine.low %v1407_v4, %v1471_v15  ;;  %v2843_v54 = vpop.eup %2842 }
 0x49a   : > { %v1336_v56 = vsel %vm1113_vm3, %v2843_v54, 0.0 }
 0x49b   : > { %v1528_v19 = vrot.slane %v1521_v16, %v3074_v22 }
 0x49d   : > { %v1529_v21 = vcombine.low %v1520_v18, %v1528_v19  ;;  %v1530_v23 = vcombine.high %v1520_v18, %v1528_v19 }
 0x49f   : > { %v1537_v24 = vrot.slane %v1529_v21, %v3081_v34  ;;  %v1544_v36 = vrot.slane %v1530_v23, %v3081_v34 }
 0x4a1   : > { %v1549_v27 = vpack.i.b16 %v1537_v24, %v1503_v20  ;;  %v1552_v29 = vshrl.u32 %v1537_v24, 16  ;;  %v1545_v31 = vcombine.high %v1537_v24, %v2929_v28  ;;  %v1568_v44 = vshrl.u32 %v1544_v36, 16 }
 0x4a2   : > { %v1565_v46 = vpack.i.b16 %v1544_v36, %v1510_v40  ;;  %v1546_v6 = vcombine.high %v1544_v36, %v2929_v28 }
 0x4a3   : > { %1579 = vxpose.xlu0.c.b16.start.end [1/1] (short) (narrow) %v1549_v27, 16  ;;  %v1553_v33 = vpack.i.b16 %v1552_v29, %v1551_v26  ;;  %v1560_v35 = vshrl.u32 %v1545_v31, 16  ;;  %v1557_v38 = vpack.i.b16 %v1545_v31, %v1511_v30  ;;  %v1569_v8 = vpack.i.b16 %v1568_v44, %v1567_v47 }
 0x4a4   : > { %v1576_v57 = vshrl.u32 %v1546_v6, 16  ;;  %v1573_v10 = vpack.i.b16 %v1546_v6, %v1512_v12 }
 0x4a5   : > { %1595 = vxpose.xlu1.c.b16.start.end [1/1] (short) (narrow) %v1553_v33, 16  ;;  %v1561_v43 = vpack.i.b16 %v1560_v35, %v1559_v39 }
 0x4a6   : > { %v1577_v59 = vpack.i.b16 %v1576_v57, %v1575_v11 }
 0x4a7   : > { %1611 = vxpose.xlu0.c.b16.start.end [1/1] (short) (narrow) %v1557_v38, 16 }
 0x4a9   : > { %1627 = vxpose.xlu1.c.b16.start.end [1/1] (short) (narrow) %v1561_v43, 16 }
 0x4ab   : > { %1643 = vxpose.xlu0.c.b16.start.end [1/1] (short) (narrow) %v1565_v46, 16 }
 0x4ad   : > { %1659 = vxpose.xlu1.c.b16.start.end [1/1] (short) (narrow) %v1569_v8, 16 }
 0x4b8   : > { %1328 = vadd.xlane.f32.xlu0 %v1327_v52 }
 0x4ba   : > { %1331 = vadd.xlane.f32.xlu1 %v1330_v50 }
 0x4bc   : > { %1334 = vadd.xlane.f32.xlu0 %v1333_v55 }
 0x4be   : > { %1337 = vadd.xlane.f32.xlu1 %v1336_v56 }
 0x4e9   : > { %1675 = vxpose.xlu0.c.b16.start.end [1/1] (short) (narrow) %v1573_v10, 16 }
 0x4eb   : > { %1691 = vxpose.xlu1.c.b16.start.end [1/1] (short) (narrow) %v1577_v59, 16 }
 0x509   : > { %v1587_v60 = vpop.trf.xlu0 }
 0x50b   : > { %v1603_v61 = vpop.trf.xlu1 }
 0x50d   : > { %v1619_v63 = vpop.trf.xlu0 }
 0x50f   : > { %v1635_v0 = vpop.trf.xlu1 }
 0x511   : > { %v1651_v2 = vpop.trf.xlu0 }
 0x512   : > { %v1707_v13 = vcombine.low %v1587_v60, %v1651_v2 }
 0x513   : > { %v1667_v3 = vpop.trf.xlu1 }
 0x514   : > { %v1732_v16 = vcombine.low %v1603_v61, %v1667_v3  ;;  %v1714_v23 = vrot.slane %v1707_v13, %v3074_v22 }
 0x516   : > { %v1739_v30 = vrot.slane %v1732_v16, %v3074_v22 }
 0x545   : > { %v1329_v4 = vpop.xlane.xlu0 %1328 }
 0x546   : > { %2844 = vrcp.f32 %v1329_v4 }
 0x547   : > { %v1332_v5 = vpop.xlane.xlu1 %1331 }
 0x548   : > { %2846 = vrcp.f32 %v1332_v5 }
 0x549   : > { %v1335_v7 = vpop.xlane.xlu0 %1334 }
 0x54a   : > { %2848 = vrcp.f32 %v1335_v7 }
 0x54b   : > { %v1338_v9 = vpop.xlane.xlu1 %1337 }
 0x54c   : > { %2850 = vrcp.f32 %v1338_v9 }
 0x54f   : > { %v1683_v14 = vpop.trf.xlu0 }
 0x550   : > { %v2845_v15 = vpop.eup %2844  ;;  %v1715_v18 = vcombine.low %v1619_v63, %v1683_v14 }
 0x551   : > { %v1699_v19 = vpop.trf.xlu1  ;;  %v1340_v20 = vmul.f32 %v2845_v15, %v2837_v51 }
 0x552   : > { %v2847_v21 = vpop.eup %2846  ;;  %v1722_v24 = vrot.slane %v1715_v18, %v3074_v22  ;;  %v1740_v25 = vcombine.low %v1635_v0, %v1699_v19 }
 0x553   : > { %v1347_v26 = vpack.c.bf16 %v1340_v20, %v1340_v20  ;;  %v1342_v27 = vmul.f32 %v2847_v21, %v2839_v62 }
 0x554   : > { %v2849_v29 = vpop.eup %2848  ;;  %v1723_v31 = vcombine.low %v1714_v23, %v1722_v24  ;;  %v1747_v32 = vrot.slane %v1740_v25, %v3074_v22 }
 0x555   : > { %v1773_v33 = vsel %vm1113_vm3, %v1347_v26, 0  ;;  %v1348_v35 = vpack.c.bf16 %v1342_v27, %v1342_v27  ;;  %v1344_v36 = vmul.f32 %v2849_v29, %v2841_v53  ;;  %v2824_v27 = vld [vmem:[%s3380_s2] sm:$0xff]  }
 0x556   : > { %v2851_v37 = vpop.eup %2850  ;;  %v1730_v38 = vrot.slane %v1723_v31, %v3081_v34  ;;  %v1748_v39 = vcombine.low %v1739_v30, %v1747_v32  ;;  %2711 = vmatpush3.bf16.xpose.msra.mxu0 %v1773_v33 }
 0x557   : > { %v1819_v40 = vsel %vm1113_vm3, %v1348_v35, 0  ;;  %2722 = vmatprep.subr.bf16.mxu0 %v2921_v1  ;;  %v1346_v41 = vmul.f32 %v2851_v37, %v2843_v54  ;;  %v1349_v43 = vpack.c.bf16 %v1344_v36, %v1344_v36 }
 0x558   : > { %v1755_v42 = vrot.slane %v1748_v39, %v3081_v34  ;;  %2717 = vmatpush3.bf16.xpose.msra.mxu1 %v1819_v40  ;;  %v1760_v44 = vshrl.u32 %v1730_v38, 16  ;;  %v1731_v49 = vcombine.high %v1730_v38, %v2929_v28 }
 0x559   : > { %2728 = vmatprep.subr.bf16.mxu1 %v2921_v1  ;;  %v1350_v46 = vpack.c.bf16 %v1346_v41, %v1346_v41  ;;  %v1865_v8 = vsel %vm1113_vm3, %v1349_v43, 0 }
 0x55a   : > { %v1759_v45 = vpack.i.b16 %v1755_v42, %v1730_v38  ;;  %v1761_v58 = vshrl.u32 %v1755_v42, 16  ;;  %v1756_v48 = vcombine.high %v1755_v42, %v2929_v28  ;;  %v1766_v52 = vshrl.u32 %v1731_v49, 16  ;;  %v2825_v38 = vld [vmem:[%s3380_s2 + $0x8] sm:$0xff]  }
 0x55b   : > { %v1911_v51 = vsel %vm1113_vm3, %v1350_v46, 0 }
 0x55c   : > { %v1762_v47 = vpack.i.b16 %v1761_v58, %v1760_v44  ;;  %v1767_v62 = vshrl.u32 %v1756_v48, 16  ;;  %v1765_v53 = vpack.i.b16 %v1756_v48, %v1731_v49 }
 0x55d   : > { %2713 = vmatmul.mubr.msk.bf16.vlgmr.msra.gmra.mrb[4].mxu0 %vm1113_vm3, %v1759_v45 }
 0x55e   : > { %2723 = vmatpush3.bf16.xpose.msra.mxu0 %v1865_v8  ;;  %2724 = vmatprep.mubr.msk.bf16.mxu0 %vm2922_vm0, %v2921_v1  ;;  %v1768_v50 = vpack.i.b16 %v1767_v62, %v1766_v52 }
 0x55f   : > { %2719 = vmatmul.mubr.msk.bf16.vlgmr.msra.gmra.mrb[16].mxu1 %vm1113_vm3, %v1762_v47  ;;  %2734 = vmatprep.subr.bf16.mxu0 %v2921_v1 }
 0x560   : > { %2729 = vmatpush3.bf16.xpose.msra.mxu1 %v1911_v51  ;;  %2730 = vmatprep.mubr.msk.bf16.mxu1 %vm2922_vm0, %v2921_v1 }
 0x561   : > { %2742 = vmatprep.subr.bf16.mxu1 %v2921_v1 }
 0x565   : > { %2725 = vmatmul.mubr.msk.bf16.vlgmr.msra.gmra.mrb[8].mxu0 %vm1113_vm3, %v1765_v53 }
 0x566   : > { %2738 = vmatprep.mubr.msk.bf16.mxu0 %vm2922_vm0, %v2921_v1  ;;  %2735 = vmatpush3.bf16.msra.mxu0 %v2824_v27  ;;  %v2321_v27 = vsub.s32 2, %v3071_v17 }
 0x567   : > { %2731 = vmatmul.mubr.msk.bf16.vlgmr.msra.gmra.mrb[20].mxu1 %vm1113_vm3, %v1768_v50  ;;  %2736 = vmatprep.subr.bf16.mxu0 %v2921_v1 }
 0x568   : > { %2746 = vmatprep.mubr.msk.bf16.mxu1 %vm2922_vm0, %v2921_v1 }
 0x56a   : > { %2737 = vmatpush3.bf16.msra.mxu0 %v2825_v38  ;;  %v2835_v38 = vld [vmem:[%s3382_s4 + $0x38] sm:$0xff]  }
 0x56b   : > { %2750 = vmatprep.subr.bf16.mxu0 %v2921_v1 }
 0x630   : > { %v1809_v28 = vpop.f32.mrb[4].mxu0 }
 0x631   : > { %1953 = vxpose.xlu0.b32.start.end [1/1] (short) (narrow) %v1809_v28, 8  ;;  %v2714_v54 = vpop.f32.mrb[5].mxu0 }
 0x632   : > { %v1812_v55 = vpop.f32.mrb[6].mxu0  ;;  %v1855_v56 = vpop.f32.mrb[16].mxu1 }
 0x633   : > { %v2715_v6 = vpop.f32.mrb[7].mxu0  ;;  %1985 = vxpose.xlu1.b32.start.end [1/1] (short) (narrow) %v1855_v56, 8  ;;  %v2720_v12 = vpop.f32.mrb[17].mxu1  ;;  %v2242_v56 = vsub.s32 0, %v3071_v17 }
 0x634   : > { %v1858_v57 = vpop.f32.mrb[18].mxu1  ;;  %v3271_v6 = vld [vmem:[%s3384_s6] sm:$0xff] }
 0x635   : > { %v2721_v10 = vpop.f32.mrb[19].mxu1  ;;  %v2243_v12 = vrot.slane %v3271_v6, %v2242_v56  ;;  %v2856_v57 = vld [vmem:[%s3046_s25] sm:$0xf] }
 0x636   : > { %v303_v10 = vunpack.c.l.bf16 %v2856_v57  ;;  %v2522_v57 = vsub.s32 5, %v3071_v17 }
 0x638   : > { %v1901_v11 = vpop.f32.mrb[8].mxu0 }
 0x639   : > { %2017 = vxpose.xlu0.b32.start.end [1/1] (short) (narrow) %v1901_v11, 8  ;;  %v2726_v59 = vpop.f32.mrb[9].mxu0 }
 0x63a   : > { %v1904_v60 = vpop.f32.mrb[10].mxu0  ;;  %v1947_v61 = vpop.f32.mrb[20].mxu1 }
 0x63b   : > { %v2727_v63 = vpop.f32.mrb[11].mxu0  ;;  %v2732_v0 = vpop.f32.mrb[21].mxu1 }
 0x63c   : > { %v1950_v2 = vpop.f32.mrb[22].mxu1 }
 0x63d   : > { %2049 = vxpose.xlu0.b32.start.end [1/1] (short) (narrow) %v1947_v61, 8  ;;  %v2733_v3 = vpop.f32.mrb[23].mxu1 }
 0x6b1   : > { %v1969_v4 = vpop.trf.xlu0 }
 0x6b3   : > { %v2001_v7 = vpop.trf.xlu1 }
 0x6b9   : > { %v2033_v5 = vpop.trf.xlu0 }
 0x6ba   : > { %v2081_v9 = vcombine.low %v1969_v4, %v2033_v5  ;;  %v2082_v13 = vcombine.high %v1969_v4, %v2033_v5 }
 0x6bc   : > { %v2089_v18 = vrot.slane %v2081_v9, %v3074_v22  ;;  %v2096_v19 = vrot.slane %v2082_v13, %v3074_v22  ;;  %v2826_v13 = vld [vmem:[%s3381_s3] sm:$0xff]  }
 0x6bd   : > { %v2065_v14 = vpop.trf.xlu0  ;;  %2743 = vmatpush3.bf16.msra.mxu1 %v2826_v13 }
 0x6be   : > { %v2097_v15 = vcombine.low %v2001_v7, %v2065_v14  ;;  %v2098_v16 = vcombine.high %v2001_v7, %v2065_v14  ;;  %v2827_v14 = vld [vmem:[%s3381_s3 + $0x8] sm:$0xff]   ;;  %2744 = vmatprep.subr.bf16.mxu1 %v2921_v1 }
 0x6c0   : > { %v2105_v20 = vrot.slane %v2097_v15, %v3074_v22  ;;  %v2112_v21 = vrot.slane %v2098_v16, %v3074_v22  ;;  %v2828_v15 = vld [vmem:[%s3382_s4] sm:$0xff]   ;;  %v2829_v16 = vld [vmem:[%s3382_s4 + $0x8] sm:$0xff]  }
 0x6c1   : > { %2745 = vmatpush3.bf16.msra.mxu1 %v2827_v14 }
 0x6c2   : > { %v2113_v23 = vcombine.low %v2089_v18, %v2105_v20  ;;  %v2114_v24 = vcombine.high %v2089_v18, %v2105_v20  ;;  %v2129_v25 = vcombine.low %v2096_v19, %v2112_v21  ;;  %v2130_v26 = vcombine.high %v2096_v19, %v2112_v21  ;;  %v2830_v18 = vld [vmem:[%s3382_s4 + $0x10] sm:$0xff]   ;;  %v2831_v19 = vld [vmem:[%s3382_s4 + $0x18] sm:$0xff]   ;;  %v2832_v20 = vld [vmem:[%s3382_s4 + $0x20] sm:$0xff]  }
 0x6c3   : > { %v2833_v21 = vld [vmem:[%s3382_s4 + $0x28] sm:$0xff]  }
 0x6c4   : > { %v2121_v29 = vrot.slane %v2113_v23, %v3081_v34  ;;  %v2128_v30 = vrot.slane %v2114_v24, %v3081_v34  ;;  %v2137_v31 = vrot.slane %v2129_v25, %v3081_v34  ;;  %v2144_v32 = vrot.slane %v2130_v26, %v3081_v34 }
 0x6c5   : > { %v2316_v26 = vsub.s32 1, %v3071_v17 }
 0x6c6   : > { %v2149_v33 = vcombine.low %v2121_v29, %v2128_v30  ;;  %v2623_v35 = vcombine.high %v2121_v29, %v2128_v30  ;;  %v2165_v36 = vcombine.low %v2137_v31, %v2144_v32  ;;  %v2624_v37 = vcombine.high %v2137_v31, %v2144_v32 }
 0x6c7   : > { %v2317_v29 = vrot.slane %v3271_v6, %v2316_v26  ;;  %v2322_v32 = vrot.slane %v3271_v6, %v2321_v27 }
 0x6c8   : > { %v2156_v39 = vrot.slane %v2149_v33, %v3074_v22  ;;  %v2164_v40 = vrot.slane %v2623_v35, %v3074_v22  ;;  %v2172_v41 = vrot.slane %v2165_v36, %v3074_v22  ;;  %v2180_v42 = vrot.slane %v2624_v37, %v3074_v22  ;;  %v2834_v37 = vld [vmem:[%s3382_s4 + $0x30] sm:$0xff]  }
 0x6ca   : > { %v2182_v43 = vcombine.high %v2156_v39, %v2164_v40  ;;  %v2198_v44 = vcombine.high %v2172_v41, %v2180_v42  ;;  %v2181_v45 = vcombine.low %v2156_v39, %v2164_v40  ;;  %v2197_v58 = vcombine.low %v2172_v41, %v2180_v42  ;;  %v2628_v39 = vld [vmem:[%s3385_s7] ss:$0 sm:$0xff] }
 0x6cc   : > { %v2196_v46 = vrot.slane %v2182_v43, %v3081_v34  ;;  %v2212_v47 = vrot.slane %v2198_v44, %v3081_v34  ;;  %v2189_v48 = vrot.slane %v2181_v45, %v3081_v34  ;;  %v2205_v8 = vrot.slane %v2197_v58, %v3081_v34 }
 0x6ce   : > { %v2215_v49 = vcombine.low %v2196_v46, %v2212_v47  ;;  %v2214_v51 = vcombine.high %v2189_v48, %v2205_v8  ;;  %v2213_v62 = vcombine.low %v2189_v48, %v2205_v8  ;;  %v2216_v22 = vcombine.high %v2196_v46, %v2212_v47 }
 0x6cf   : > { %v2411_v46 = vsub.s32 3, %v3071_v17 }
 0x6d0   : > { %2222 = vrot.lane.b32.xlu0 %v2215_v49, %s2931_s24  ;;  %2218 = vrot.lane.b32.xlu1 %v2214_v51, %s2932_s26  ;;  %s294_s26 = sand.u32 1, %s2911_s28  }
 0x6d1   : > { %s2529_s20 = scalar_lea.sflag [#allocation3], %s294_s26 }
 0x6d4   : > { %2226 = vrot.lane.b32.xlu1 %v2216_v22, %s2933_s10  ;;  %s2605_s10 = sshll.u32 %s294_s26, 2 }
 0x6d5   : > { %s296_s13 = scalar_lea.vmem [#allocation2], %s2605_s10 }
 0x6d6   : > { %s2542_s17 = sshll.u32 %s296_s13, 4  ;;  %s3338_s17 = int_to_ptr.vmem [resolvable:$true] %s2542_s17 }
 0x6d7   : > { %s2857_s21 = scalar_lea.vmem %s3338_s17, 64  ;;  %p2864_p0 = scmp.lt.s32.totalorder %s3338_s17, %s2862_s22 }
 0x6d8   : > { %p2858_p11 = scmp.ne.s32.totalorder %s3338_s17, %s2857_s21  ;;  %p2865_p1 = scmp.lt.s32.totalorder %s2863_s23, %s2857_s21 }
 0x6da   : > { %p2859_p12 = pnand %p2858_p11, %p3018_p5  ;;  %p2866_p2 = por %p2865_p1, %p2864_p0 }
 0x6dc   : > { %p2860_p13 = pneg %p2859_p12 }
 0x6de   : > { %p2867_p3 = pnand %p2866_p2, %p2860_p13 }
 0x742   : > { %v2219_v52 = vpop.permute.xlu1 %2218  ;;  %v2223_v53 = vpop.permute.xlu0 %2222 }
 0x743   : > { %v2229_v50 = vsel %vm1113_vm3, %v2213_v62, %v2219_v52 }
 0x744   : > { %v2231_v54 = vsel %vm2230_vm4, %v2229_v50, %v2223_v53 }
 0x746   : > { %v2227_v28 = vpop.permute.xlu1 %2226 }
 0x747   : > { %v2233_v34 = vsel %vm2232_vm5, %v2231_v54, %v2227_v28 }
 0x748   : > { %v2235_v55 = vpack.c.bf16 %v2233_v34, %v2233_v34 }
 0x74a   : > { %2739 = vmatmul.mubr.msk.bf16.vlgmr.msra.gmra.mrb[12].mxu0 %vm327_vm1, %v2235_v55 }
 0x74b   : > { %2766 = vmatprep.mubr.msk.bf16.mxu0 %vm2922_vm0, %v2921_v1  ;;  %2751 = vmatpush3.bf16.msra.mxu0 %v2828_v15 }
 0x74c   : > { %2752 = vmatprep.subr.bf16.mxu0 %v2921_v1 }
 0x74f   : > { %2753 = vmatpush3.bf16.msra.mxu0 %v2829_v16 }
 0x750   : > { %2754 = vmatprep.subr.bf16.mxu0 %v2921_v1 }
 0x753   : > { %2755 = vmatpush3.bf16.msra.mxu0 %v2830_v18 }
 0x754   : > { %2756 = vmatprep.subr.bf16.mxu0 %v2921_v1 }
 0x757   : > { %2757 = vmatpush3.bf16.msra.mxu0 %v2831_v19 }
 0x758   : > { %2758 = vmatprep.subr.bf16.mxu0 %v2921_v1 }
 0x75b   : > { %2759 = vmatpush3.bf16.msra.mxu0 %v2832_v20 }
 0x75c   : > { %2760 = vmatprep.subr.bf16.mxu0 %v2921_v1 }
 0x75f   : > { %2761 = vmatpush3.bf16.msra.mxu0 %v2833_v21 }
 0x760   : > { %2762 = vmatprep.subr.bf16.mxu0 %v2921_v1 }
 0x763   : > { %2763 = vmatpush3.bf16.msra.mxu0 %v2834_v37 }
 0x764   : > { %2764 = vmatprep.subr.bf16.mxu0 %v2921_v1  ;;  %v2412_v1 = vrot.slane %v3271_v6, %v2411_v46 }
 0x767   : > { %2765 = vmatpush3.bf16.msra.mxu0 %v2835_v38 }
 0x81d   : > { %v2293_v11 = vpop.f32.mrb[12].mxu0 }
 0x81e   : > { %v2294_v59 = vadd.f32 %v2293_v11, %v2243_v12  ;;  %v2740_v60 = vpop.f32.mrb[13].mxu0  ;;  %v2517_v12 = vsub.s32 4, %v3071_v17 }
 0x81f   : > { %v2296_v61 = vpop.f32.mrb[14].mxu0  ;;  %v2523_v60 = vrot.slane %v3271_v6, %v2522_v57 }
 0x820   : > { %v2741_v63 = vpop.f32.mrb[15].mxu0  ;;  %v2299_v0 = vadd.f32 %v2294_v59, %v303_v10  ;;  %v2518_v10 = vrot.slane %v3271_v6, %v2517_v12 }
 0x822   : > { %v2300_v2 = vsel %vm327_vm1, %v2299_v0, 0.0 }
 0x823   : > { %2301 = vadd.xlane.f32.xlu1 %v2300_v2 }
 0x8b0   : > { %v2302_v3 = vpop.xlane.xlu1 %2301 }
 0x8b1   : > { %v2304_v4 = vmul.f32 0.03125, %v2302_v3 }
 0x8b3   : > { %v2305_v5 = vsub.f32 %v2299_v0, %v2304_v4 }
 0x8b5   : > { %v2306_v7 = vmul.f32 %v2305_v5, %v2305_v5 }
 0x8b7   : > { %v2307_v9 = vsel %vm327_vm1, %v2306_v7, 0.0 }
 0x8b8   : > { %2308 = vadd.xlane.f32.xlu0 %v2307_v9 }
 0x945   : > { %v2309_v23 = vpop.xlane.xlu0 %2308 }
 0x946   : > { %v2310_v24 = vmul.f32 0.03125, %v2309_v23 }
 0x948   : > { %v2311_v25 = vadd.f32 1e-05, %v2310_v24 }
 0x94a   : > { %2852 = vrsqrt.f32 %v2311_v25 }
 0x954   : > { %v2853_v30 = vpop.eup %2852 }
 0x955   : > { %v2313_v31 = vmul.f32 %v2853_v30, %v2305_v5 }
 0x957   : > { %v2318_v33 = vmul.f32 %v2317_v29, %v2313_v31 }
 0x959   : > { %v2323_v35 = vadd.f32 %v2322_v32, %v2318_v33 }
 0x95b   : > { %v2324_v36 = vpack.c.bf16 %v2323_v35, %v2323_v35 }
 0x95d   : > { %2747 = vmatmul.mubr.msk.bf16.vlgmr.msra.gmra.mrb[24].mxu1 %vm327_vm1, %v2324_v36 }
 0xa30   : > { %v2385_v40 = vpop.f32.mrb[24].mxu1 }
 0xa31   : > { %v2386_v41 = vadd.f32 %v2628_v39, %v2385_v40  ;;  %v2748_v42 = vpop.f32.mrb[25].mxu1 }
 0xa32   : > { %v2388_v43 = vpop.f32.mrb[26].mxu1 }
 0xa33   : > { %v2391_v44 = vmax.f32 %v2386_v41, 0.0  ;;  %v2749_v45 = vpop.f32.mrb[27].mxu1 }
 0xa35   : > { %v2392_v58 = vpack.c.bf16 %v2391_v44, %v2391_v44 }
 0xa37   : > { %2767 = vmatmul.mubr.bf16.vlgmr.msra.gmra.mrb[16].mxu0 %v2392_v58 }
 0xb0a   : > { %v2495_v47 = vpop.f32.mrb[16].mxu0 }
 0xb0b   : > { %v2496_v48 = vadd.f32 %v2495_v47, %v2412_v1  ;;  %v2768_v8 = vpop.f32.mrb[17].mxu0 }
 0xb0c   : > { %v2498_v49 = vpop.f32.mrb[18].mxu0 }
 0xb0d   : > { %v2769_v51 = vpop.f32.mrb[19].mxu0  ;;  %v2501_v62 = vadd.f32 %v2496_v48, %v2323_v35 }
 0xb0f   : > { %v2502_v22 = vsel %vm327_vm1, %v2501_v62, 0.0 }
 0xb10   : > { %2503 = vadd.xlane.f32.xlu1 %v2502_v22 }
 0xb9d   : > { %v2504_v52 = vpop.xlane.xlu1 %2503 }
 0xb9e   : > { %v2505_v53 = vmul.f32 0.03125, %v2504_v52 }
 0xba0   : > { %v2506_v50 = vsub.f32 %v2501_v62, %v2505_v53 }
 0xba2   : > { %v2507_v28 = vmul.f32 %v2506_v50, %v2506_v50 }
 0xba4   : > { %v2508_v54 = vsel %vm327_vm1, %v2507_v28, 0.0 }
 0xba5   : > { %2509 = vadd.xlane.f32.xlu0 %v2508_v54 }
 0xc32   : > { %v2510_v34 = vpop.xlane.xlu0 %2509 }
 0xc33   : > { %v2511_v55 = vmul.f32 0.03125, %v2510_v34 }
 0xc35   : > { %v2512_v56 = vadd.f32 1e-05, %v2511_v55 }
 0xc37   : > { %2854 = vrsqrt.f32 %v2512_v56 }
 0xc41   : > { %v2855_v11 = vpop.eup %2854 }
 0xc42   : > { %v2514_v59 = vmul.f32 %v2855_v11, %v2506_v50 }
 0xc44   : > { %v2519_v61 = vmul.f32 %v2518_v10, %v2514_v59 }
 0xc46   : > { %v2524_v63 = vadd.f32 %v2523_v60, %v2519_v61 }
 0xc48   : > { %v2525_v0 = vpack.c.bf16 %v2524_v63, %v2524_v63 }
 0xc4a   : > { %2527 = vst.msk [vmem:[%s296_s13] sm:$0xf] %vm2526_vm6, %v2525_v0 }
 0xc4b   : > { %2870 = shalt.err (!%p2867_p3)
}
 0xc4c   : > { %s2871_s24 = scalar_lea.hbm %s3336_s19, 64  ;;  %s2875_s12 = scalar_lea.hbm %s3386_s8, 128 }
 0xc4d   : > { %p2872_p4 = scmp.ne.s32.totalorder %s3336_s19, %s2871_s24  ;;  %p2876_p9 = scmp.lt.u32.totalorder %s3336_s19, %s3386_s8 }
 0xc4e   : > { %p2877_p10 = scmp.lt.u32.totalorder %s2875_s12, %s2871_s24  ;;  %p2879_p12 = scmp.lt.u32.totalorder %s2871_s24, %s3336_s19 }
 0xc4f   : > { %p2873_p7 = pnand %p2872_p4, %p3018_p5 }
 0xc50   : > { %p2878_p11 = por %p2877_p10, %p2876_p9 }
 0xc51   : > { %p2874_p8 = pneg %p2873_p7 }
 0xc52   : > { %p2880_p13 = por %p2879_p12, %p2878_p11 }
 0xc54   : > { %p2881_p0 = pnand %p2880_p13, %p2874_p8 }
 0xc56   : > { %2884 = shalt.err (!%p2881_p0)
}
 0xc57   : > { %2770 = dma.vmem_to_hbm [thread:$0]  (%p3018_p5), %s3338_s17, 64, %s3336_s19, %s2529_s20  }
 0xc58 PF: > { %p2776_p1 = scmp.ge.s32.totalorder %s2919_s30, 2  ;;  %s2554_s25 = sand.u32 1, %s2907_s27  }
 0xc59   : > { %s2555_s21 = scalar_lea.sflag [#allocation3], %s2554_s25 }
 0xc5a   : > { %p2773_p2 = pnand %p2776_p1, %p3022_p6 }
 0xc5c   : > { %2902 = dma.done.wait (!%p2773_p2), %s2555_s21, 64  }
 0xc5d   : > { %2904 = vsyncadd (!%p2773_p2), %s2555_s21, 4294967232  ;;  %p18_p3 = scmp.ge.s32.totalorder %s3005_s11, 4   ;;  %s3389_s27 = smov %s2911_s28 }
 0xc5e   : > { %s3390_s28 = smov %s2915_s29  ;;  %s3391_s29 = smov %s3016_s14 }
 0xc5f   : > { %s3392_s30 = smov %s3005_s11  ;;  %20 = sbr.rel (!%p18_p3) target bundleno = 3 (0x3), region = 87 }
 0xc66   :  { %2560 = vsyncpa [#allocation3], 1 }
 0xc67   :  { %2562 = vsyncpa [#allocation3 + $0x1], 1 }

</bundles_post_ra>
